<compile_context>
chip_gen: v5e
topology: v5e:2x2
jax: 0.10.0
libtpu: 0.0.40
codegen_flags: <defaults>
</compile_context>

<pallas_src>
import functools

import jax
import jax.numpy as jnp
from jax.experimental import pallas as pl
from jax.experimental.pallas import tpu as pltpu

_MIB = 1024 * 1024
# Per-step logits-block budget measured in f32 compute bytes.  1-2 MiB blocks
# already sit at ~85% of the HBM roofline on v5e/v6e/v7x while leaving ample
# VMEM headroom (v7x: 64 MiB physical / 32 MiB default scoped per TensorCore).
_BLOCK_BUDGET_BYTES = 2 * _MIB
# Keep at least this many grid steps (pipelining + both v7x TensorCores).
_MIN_GRID_STEPS = 8
_VMEM_CEILING = 32 * _MIB


def _round_up(x, m):
    return -(-x // m) * m


def _focal_pow(x, gamma):
    """x**gamma with cheap special cases (generic pow = log+exp on the EUP)."""
    g = float(gamma)
    if g == 0.0:
        return jnp.ones_like(x)
    if g == 0.5:
        return jnp.sqrt(x)
    if g == 1.0:
        return x
    if g == 1.5:
        return x * jnp.sqrt(x)
    if g == 2.0:
        return x * x
    if g.is_integer() and 2.0 < g <= 8.0:
        r = x
        for _ in range(int(g) - 1):
            r = r * x
        return r
    return jnp.power(x, g)


def _focal_loss_kernel(*refs, gamma, has_alpha, reduce_out, approx_recip,
                       n_total, hw_total, tile_n, tile_hw, mask_n, mask_hw):
    # refs: x_ref (TN, C, T) logits, t_ref (TN, 1, T) narrow-int targets,
    #       [a_ref (C, 1) alpha], o_ref: (TN, 1, T) loss  OR  (1, T) partial sum
    if has_alpha:
        x_ref, t_ref, a_ref, o_ref = refs
    else:
        x_ref, t_ref, o_ref = refs
        a_ref = None

    x = x_ref[...].astype(jnp.float32)                 # cast after load
    t = t_ref[...].astype(jnp.int32)                   # widen narrow targets

    # Stable softmax pieces along the class (sublane) axis.  `x - m` feeds the
    # exp directly so the z temporary dies immediately (VMEM high-water).
    m = jnp.max(x, axis=1, keepdims=True)              # (TN, 1, T)
    ez = jnp.exp(x - m)                                # (TN, C, T) single bulk exp
    denom = jnp.sum(ez, axis=1, keepdims=True)         # (TN, 1, T)

    # Target-class selection via mask (no dynamic gather on TPU).
    cls = jax.lax.broadcasted_iota(jnp.int32, x.shape, 1)
    hit = cls == t                                     # (TN, C, T)

    x_t = jnp.sum(jnp.where(hit, x, 0.0), axis=1, keepdims=True)   # x[target]
    e_t = jnp.sum(jnp.where(hit, ez, 0.0), axis=1, keepdims=True)  # exp(z)[target]

    logpt = (x_t - m) - jnp.log(denom)                 # gathered log_softmax
    if approx_recip:
        pt = e_t * pl.reciprocal(denom, approx=True)   # EUP vrcp path
    else:
        pt = e_t / denom                               # exact divide
    one_minus_pt = jnp.maximum(1.0 - pt, 0.0)          # clamp (pt may round > 1)

    if has_alpha:
        alpha = a_ref[...].astype(jnp.float32)[jnp.newaxis]  # (1, C, 1)
        a_t = jnp.sum(jnp.where(hit, alpha, 0.0), axis=1, keepdims=True)
        logpt = logpt * a_t

    loss = -1.0 * _focal_pow(one_minus_pt, gamma) * logpt       # (TN, 1, T)

    if not reduce_out:
        o_ref[...] = loss
        return

    # size_average path: per-(n-tile) partial sums accumulated across the hw
    # grid axis (output block revisited -> that axis is "arbitrary").  Ragged
    # tails (block padding holds garbage) are masked before accumulation.
    if mask_n or mask_hw:
        valid = None
        if mask_hw:
            lane = jax.lax.broadcasted_iota(jnp.int32, loss.shape, 2)
            valid = (pl.program_id(1) * tile_hw + lane) < hw_total
        if mask_n:
            row = jax.lax.broadcasted_iota(jnp.int32, loss.shape, 0)
            vn = (pl.program_id(0) * tile_n + row) < n_total
            valid = vn if valid is None else jnp.logical_and(valid, vn)
        loss = jnp.where(valid, loss, 0.0)

    @pl.when(pl.program_id(1) == 0)
    def _():
        o_ref[...] = jnp.zeros_like(o_ref)

    o_ref[...] += jnp.sum(loss, axis=0)                # (1, T) partial


def focal_loss(logits, target, *, gamma=0.5, alpha=None, size_average=False,
               approx_recip=True, block_budget_bytes=_BLOCK_BUDGET_BYTES):
    """Pallas FocalLoss forward.

    logits: float array, (N, C, *spatial) (NCHW-style) or (M, C)
    target: int array with N*prod(spatial) (or M) elements
    alpha : None, float (2-class), or per-class weight list/array
    """
    logits = jnp.asarray(logits)
    target = jnp.asarray(target)

    if logits.ndim > 2:
        n, c = logits.shape[0], logits.shape[1]
        x = logits.reshape(n, c, -1)            # (N, C, HW); transpose fused in kernel
    else:
        _, c = logits.shape
        x = jnp.swapaxes(logits, 0, 1)[None]    # (1, C, M)
        n = 1
    hw = x.shape[-1]

    # Targets: narrow dtype in HBM (int32 is ~17% of per-element traffic at
    # C=4 f32); widened back to int32 inside the kernel.
    if c <= 127:
        tgt_dtype = jnp.int8
    elif c <= 32767:
        tgt_dtype = jnp.int16
    else:
        tgt_dtype = jnp.int32
    t = target.reshape(n, 1, hw).astype(tgt_dtype)

    # alpha handling (same semantics as the module's __init__); alpha=None is
    # specialized away entirely (no input, no masked reduction).
    has_alpha = alpha is not None
    alpha_col = None
    if has_alpha:
        if isinstance(alpha, (float, int)):
            assert c == 2, "scalar alpha implies a 2-class problem"
            alpha_vec = jnp.array([float(alpha), 1.0 - float(alpha)], jnp.float32)
        else:
            alpha_vec = jnp.asarray(alpha, dtype=jnp.float32)
            assert alpha_vec.shape[0] == c
        alpha_col = alpha_vec.reshape(c, 1)

    # ---- tiling (corrected VMEM accounting) --------------------------------
    itemsize = jnp.dtype(x.dtype).itemsize
    tgt_itemsize = jnp.dtype(tgt_dtype).itemsize
    c_pad = _round_up(c, 8)                      # sublane-padded class count
    hw_lanes = _round_up(hw, 128)
    total_cols = n * hw_lanes

    # Budget columns by the f32 compute footprint of the logits block ...
    cols_budget = max(128, (block_budget_bytes // (c_pad * 4)) // 128 * 128)
    # ... and cap so there are >= _MIN_GRID_STEPS grid steps when possible.
    cols_steps = max(128, _round_up(-(-total_cols // _MIN_GRID_STEPS), 128))
    cols_cap = min(cols_budget, cols_steps)

    if hw >= cols_cap:
        tile_n, tile_hw = 1, cols_cap            # tile the spatial axis
    else:
        tile_hw = hw                             # full hw extent per step
        tile_n = max(1, min(n, cols_cap // hw_lanes))   # batch small images
    grid = (pl.cdiv(n, tile_n), pl.cdiv(hw, tile_hw))

    # Scoped-VMEM estimate: double-buffered blocks (the (.,1,.) target/output
    # blocks pad to 8 sublanes!) + headroom for full-size f32 kernel temps.
    thw_pad = _round_up(tile_hw, 128)
    blk_in = tile_n * c_pad * thw_pad * itemsize
    blk_tgt = tile_n * 8 * thw_pad * tgt_itemsize
    blk_out = (8 * thw_pad * 4) if size_average else (tile_n * 8 * thw_pad * 4)
    f32_blk = tile_n * c_pad * thw_pad * 4
    vmem_est = 2 * (blk_in + blk_tgt + blk_out) + 6 * f32_blk + 2 * _MIB
    vmem_limit = int(min(_VMEM_CEILING, max(4 * _MIB, vmem_est)))

    reduce_out = bool(size_average)
    kernel = functools.partial(
        _focal_loss_kernel, gamma=float(gamma), has_alpha=has_alpha,
        reduce_out=reduce_out, approx_recip=bool(approx_recip),
        n_total=n, hw_total=hw, tile_n=tile_n, tile_hw=tile_hw,
        mask_n=(n % tile_n) != 0, mask_hw=(hw % tile_hw) != 0)

    in_specs = [
        pl.BlockSpec((tile_n, c, tile_hw), lambda i, j: (i, 0, j)),   # logits
        pl.BlockSpec((tile_n, 1, tile_hw), lambda i, j: (i, 0, j)),   # targets
    ]
    inputs = [x, t]
    if has_alpha:
        in_specs.append(pl.BlockSpec((c, 1), lambda i, j: (0, 0)))    # alpha
        inputs.append(alpha_col)

    if reduce_out:
        # Per-(n-tile) partial sums, accumulated across the hw axis.
        out_shape = jax.ShapeDtypeStruct((grid[0], 1, tile_hw), jnp.float32)
        out_specs = pl.BlockSpec((None, 1, tile_hw), lambda i, j: (i, 0, 0))
        dim_sem = ("parallel", "arbitrary")
    else:
        out_shape = jax.ShapeDtypeStruct((n, 1, hw), jnp.float32)
        out_specs = pl.BlockSpec((tile_n, 1, tile_hw), lambda i, j: (i, 0, j))
        dim_sem = ("parallel", "parallel")

    out = pl.pallas_call(
        kernel,
        out_shape=out_shape,
        grid_spec=pltpu.PrefetchScalarGridSpec(
            num_scalar_prefetch=0,
            grid=grid,
            in_specs=in_specs,
            out_specs=out_specs,
        ),
        compiler_params=pltpu.CompilerParams(
            dimension_semantics=dim_sem,
            vmem_limit_bytes=vmem_limit),
    )(*inputs)

    if reduce_out:
        return jnp.sum(out) / (n * hw)           # finish the mean in XLA
    return out.reshape(-1)                       # n-major, spatial-minor order


def _focal_loss_ref(logits, target, gamma=0.5, alpha=None):
    """Pure-JAX reference mirroring the PyTorch forward."""
    if logits.ndim > 2:
        n, c = logits.shape[0], logits.shape[1]
        logits = jnp.transpose(logits.reshape(n, c, -1), (0, 2, 1)).reshape(-1, c)
    t = target.reshape(-1).astype(jnp.int32)
    logp = jax.nn.log_softmax(logits.astype(jnp.float32), axis=-1)
    logpt = jnp.take_along_axis(logp, t[:, None], axis=1)[:, 0]
    pt = jnp.exp(logpt)
    if alpha is not None:
        a = jnp.asarray(alpha, dtype=jnp.float32)
        logpt = logpt * a[t]
    return -1.0 * (1.0 - pt) ** gamma * logpt


if __name__ == "__main__":
    key = jax.random.PRNGKey(0)
    k1, k2 = jax.random.split(key)

    N, C, H, W = 2, 4, 16, 16
    gamma = 0.5
    alpha = [0.1, 0.2, 0.3, 0.4]          # deterministic per-class weights

    logits = jax.random.normal(k1, (N, C, H, W), dtype=jnp.float32)
    target = jax.random.randint(k2, (N, H, W), 0, C, dtype=jnp.int32)

    ref = _focal_loss_ref(logits, target, gamma=gamma, alpha=alpha)
    ref_noalpha = _focal_loss_ref(logits, target, gamma=gamma, alpha=None)

    # 1) exact-divide path, per-element output, alpha weights (tight parity)
    loss = focal_loss(logits, target, gamma=gamma, alpha=alpha,
                      size_average=False, approx_recip=False)
    loss = jax.block_until_ready(loss)
    assert loss.shape == (N * H * W,)
    assert jnp.allclose(loss, ref, atol=1e-5, rtol=1e-5), "mismatch (exact path)"

    # 2) approx-reciprocal (EUP vrcp) path with alpha=None specialization
    loss2 = focal_loss(logits, target, gamma=gamma, alpha=None,
                       size_average=False, approx_recip=True)
    loss2 = jax.block_until_ready(loss2)
    assert jnp.allclose(loss2, ref_noalpha, atol=1e-3, rtol=1e-2), \
        "mismatch (approx-reciprocal path)"

    # 3) fused size_average path (per-tile partial sums, mean finished in XLA)
    lmean = focal_loss(logits, target, gamma=gamma, alpha=alpha,
                       size_average=True, approx_recip=False)
    lmean = jax.block_until_ready(lmean)
    assert jnp.allclose(lmean, jnp.mean(ref), atol=1e-5, rtol=1e-4), \
        "mismatch (size_average path)"

    print("KERNEL_OK")
</pallas_src>

<mosaic_0001>
module attributes {stable_mosaic.version = 11 : i64} {
  func.func @_focal_loss_kernel(%arg0: i32, %arg1: i32, %arg2: memref<1x4x128xf32, #tpu.memory_space<vmem>>, %arg3: memref<1x1x128xi8, #tpu.memory_space<vmem>>, %arg4: memref<4x1xf32, #tpu.memory_space<vmem>>, %arg5: memref<1x1x128xf32, #tpu.memory_space<vmem>>) attributes {dimension_semantics = [#tpu.dimension_semantics<parallel>, #tpu.dimension_semantics<parallel>], iteration_bounds = array<i64: 2, 2>, scalar_prefetch = 0 : i64, scratch_operands = 0 : i64, tpu.core_type = #tpu.core_type<tc>, window_params = [{transform_indices = @transform_0, window_bounds = array<i64: 1, 4, 128>}, {transform_indices = @transform_1, window_bounds = array<i64: 1, 1, 128>}, {pipeline_mode = #tpu.pipeline_mode<synchronous>, transform_indices = @transform_2, window_bounds = array<i64: 4, 1>}, {transform_indices = @transform_3, window_bounds = array<i64: 1, 1, 128>}]} {
    %c0 = arith.constant 0 : index
    %c0_0 = arith.constant 0 : index
    %c0_1 = arith.constant 0 : index
    %0 = vector.load %arg2[%c0, %c0_0, %c0_1] : memref<1x4x128xf32, #tpu.memory_space<vmem>>, vector<1x4x128xf32>
    %c0_2 = arith.constant 0 : index
    %c0_3 = arith.constant 0 : index
    %c0_4 = arith.constant 0 : index
    %1 = vector.load %arg3[%c0_2, %c0_3, %c0_4] : memref<1x1x128xi8, #tpu.memory_space<vmem>>, vector<1x1x128xi8>
    %2 = arith.extsi %1 : vector<1x1x128xi8> to vector<1x1x128xi32>
    %cst = arith.constant dense<0xFF800000> : vector<1x128xf32>
    %3 = vector.multi_reduction <maximumf>, %0, %cst [1] : vector<1x4x128xf32> to vector<1x128xf32>
    %4 = vector.shape_cast %3 : vector<1x128xf32> to vector<1x1x128xf32>
    %5 = vector.broadcast %4 : vector<1x1x128xf32> to vector<1x4x128xf32>
    %6 = arith.subf %0, %5 : vector<1x4x128xf32>
    %7 = math.exp %6 : vector<1x4x128xf32>
    %cst_5 = arith.constant dense<0.000000e+00> : vector<1x128xf32>
    %8 = vector.multi_reduction <add>, %7, %cst_5 [1] : vector<1x4x128xf32> to vector<1x128xf32>
    %9 = vector.shape_cast %8 : vector<1x128xf32> to vector<1x1x128xf32>
    %10 = tpu.iota {dimensions = array<i32: 1>} : vector<1x4x128xi32>
    %11 = vector.broadcast %2 : vector<1x1x128xi32> to vector<1x4x128xi32>
    %12 = arith.cmpi eq, %10, %11 : vector<1x4x128xi32>
    %cst_6 = arith.constant 0.000000e+00 : f32
    %13 = vector.broadcast %cst_6 : f32 to vector<1x4x128xf32>
    %14 = arith.select %12, %0, %13 : vector<1x4x128xi1>, vector<1x4x128xf32>
    %cst_7 = arith.constant dense<0.000000e+00> : vector<1x128xf32>
    %15 = vector.multi_reduction <add>, %14, %cst_7 [1] : vector<1x4x128xf32> to vector<1x128xf32>
    %16 = vector.shape_cast %15 : vector<1x128xf32> to vector<1x1x128xf32>
    %cst_8 = arith.constant 0.000000e+00 : f32
    %17 = vector.broadcast %cst_8 : f32 to vector<1x4x128xf32>
    %18 = arith.select %12, %7, %17 : vector<1x4x128xi1>, vector<1x4x128xf32>
    %cst_9 = arith.constant dense<0.000000e+00> : vector<1x128xf32>
    %19 = vector.multi_reduction <add>, %18, %cst_9 [1] : vector<1x4x128xf32> to vector<1x128xf32>
    %20 = vector.shape_cast %19 : vector<1x128xf32> to vector<1x1x128xf32>
    %21 = arith.subf %16, %4 : vector<1x1x128xf32>
    %22 = math.log %9 : vector<1x1x128xf32>
    %23 = arith.subf %21, %22 : vector<1x1x128xf32>
    %24 = arith.divf %20, %9 : vector<1x1x128xf32>
    %cst_10 = arith.constant 1.000000e+00 : f32
    %25 = vector.broadcast %cst_10 : f32 to vector<1x1x128xf32>
    %26 = arith.subf %25, %24 : vector<1x1x128xf32>
    %cst_11 = arith.constant 0.000000e+00 : f32
    %27 = vector.broadcast %cst_11 : f32 to vector<1x1x128xf32>
    %28 = arith.maximumf %26, %27 : vector<1x1x128xf32>
    %c0_12 = arith.constant 0 : index
    %c0_13 = arith.constant 0 : index
    %29 = vector.load %arg4[%c0_12, %c0_13] : memref<4x1xf32, #tpu.memory_space<vmem>>, vector<4x1xf32>
    %30 = vector.shape_cast %29 : vector<4x1xf32> to vector<1x4x1xf32>
    %cst_14 = arith.constant 0.000000e+00 : f32
    %31 = vector.shape_cast %30 : vector<1x4x1xf32> to vector<1x4x1xf32>
    %32 = vector.broadcast %31 : vector<1x4x1xf32> to vector<1x4x128xf32>
    %33 = vector.broadcast %cst_14 : f32 to vector<1x4x128xf32>
    %34 = arith.select %12, %32, %33 : vector<1x4x128xi1>, vector<1x4x128xf32>
    %cst_15 = arith.constant dense<0.000000e+00> : vector<1x128xf32>
    %35 = vector.multi_reduction <add>, %34, %cst_15 [1] : vector<1x4x128xf32> to vector<1x128xf32>
    %36 = vector.shape_cast %35 : vector<1x128xf32> to vector<1x1x128xf32>
    %37 = arith.mulf %23, %36 : vector<1x1x128xf32>
    %38 = math.sqrt %28 : vector<1x1x128xf32>
    %cst_16 = arith.constant -1.000000e+00 : f32
    %39 = vector.broadcast %cst_16 : f32 to vector<1x1x128xf32>
    %40 = arith.mulf %39, %38 : vector<1x1x128xf32>
    %41 = arith.mulf %40, %37 : vector<1x1x128xf32>
    %c0_17 = arith.constant 0 : index
    %c0_18 = arith.constant 0 : index
    %c0_19 = arith.constant 0 : index
    %42 = vector.load %arg5[%c0_17, %c0_18, %c0_19] : memref<1x1x128xf32, #tpu.memory_space<vmem>>, vector<1x1x128xf32>
    tpu.vector_store %arg5[%c0_17, %c0_18, %c0_19], %41 {strides = array<i32>} : memref<1x1x128xf32, #tpu.memory_space<vmem>>, vector<1x1x128xf32>,
    return
  }
  func.func @transform_0(%arg0: i32, %arg1: i32) -> (i32, i32, i32) {
    %c0_i32 = arith.constant 0 : i32
    %c0_i32_0 = arith.constant 0 : i32
    return %arg0, %c0_i32, %arg1 : i32, i32, i32
  }
  func.func @transform_1(%arg0: i32, %arg1: i32) -> (i32, i32, i32) {
    %c0_i32 = arith.constant 0 : i32
    %c0_i32_0 = arith.constant 0 : i32
    return %arg0, %c0_i32, %arg1 : i32, i32, i32
  }
  func.func @transform_2(%arg0: i32, %arg1: i32) -> (i32, i32) {
    %c0_i32 = arith.constant 0 : i32
    %c0_i32_0 = arith.constant 0 : i32
    %c0_i32_1 = arith.constant 0 : i32
    return %c0_i32, %c0_i32_0 : i32, i32
  }
  func.func @transform_3(%arg0: i32, %arg1: i32) -> (i32, i32, i32) {
    %c0_i32 = arith.constant 0 : i32
    %c0_i32_0 = arith.constant 0 : i32
    return %arg0, %c0_i32, %arg1 : i32, i32, i32
  }
}

</mosaic_0001>

<bundles_post_ra>
// kernel: tpu_custom_call.1
= control target key start
LH: loop header
LB: loop body
LE: loop exit
PB: predicated region body
PF: predicated region fallthrough
CT: control target
= control target key end

     0   :  { %8 = vsyncpa [#allocation3], 0  ;;  %s853_s0 = inlined_call_operand.hbm [shape: f32[2,4,256], index: 0, kind: input, shape index: {}]   ;;  %s854_s1 = inlined_call_operand.vmem [shape: s8[2,1,256], index: 1, kind: input, shape index: {}]   ;;  %s855_s2 = inlined_call_operand.vmem [shape: f32[4,1], index: 2, kind: input, shape index: {}]   ;;  %s856_s3 = inlined_call_operand.hbm [shape: f32[2,1,256], index: 3, kind: output, shape index: {}]  }
   0x1   :  { %10 = vsyncpa [#allocation3 + $0x1], 0 }
   0x2   :  { %11 = vsyncpa [#allocation4], 0 }
   0x3   :  { %13 = vsyncpa [#allocation4 + $0x1], 0  ;;  %s688_s12 = smov 0   ;;  %s690_s13 = smov 0  }
   0x4   :  { %s692_s14 = smov 0   ;;  %s694_s15 = smov 0  }
   0x5   :  { %s696_s16 = smov 0   ;;  %s698_s17 = smov 0  }
   0x6   :  { %s700_s18 = smov 0   ;;  %s702_s19 = smov 0  }
   0x7 LB: > { %s436_s20 = sadd.s32 4294967295, %s665_s19   ;;  %s437_s21 = sadd.s32 4294967294, %s665_s19   ;;  %s665_s19 = sphi %s702_s19, %s19_s19   ;;  %s661_s18 = sphi %s700_s18, %s870_s18   ;;  %s657_s17 = sphi %s698_s17, %s869_s17   ;;  %s653_s16 = sphi %s696_s16, %s868_s16   ;;  %s649_s15 = sphi %s694_s15, %s867_s15   ;;  %s645_s14 = sphi %s692_s14, %s866_s14   ;;  %s641_s13 = sphi %s690_s13, %s865_s13   ;;  %s637_s12 = sphi %s688_s12, %s864_s12  }
   0x8   : > { %s28_s22 = sadd.s32 1, %s657_s17  ;;  %s31_s23 = sadd.s32 1, %s661_s18 }
   0x9   : > { %p29_p0 = scmp.ge.s32.totalorder %s28_s22, 2  ;;  %s40_s24 = sadd.s32 1, %s645_s14 }
   0xa   : > { %p47_p1 = scmp.ne.s32.totalorder %s645_s14, %s641_s13  ;;  %p48_p2 = scmp.eq.s32.totalorder %s665_s19, 0 }
   0xb   : > { %s872_s22 = smov (%p29_p0, %s28_s22), 0  ;;  %s874_s23 = smov (!%p29_p0, %s31_s23), %s661_s18 }
   0xc   : > { %s36_s25 = ssub.s32 %s657_s17, %s872_s22  ;;  %p741_p3 = por %p48_p2, %p47_p1 }
   0xd   : > { %p33_p4 = scmp.ge.s32.totalorder %s874_s23, 2  ;;  %p53_p5 = scmp.ne.s32.totalorder %s641_s13, %s637_s12 }
   0xe   : > { %p54_p6 = scmp.eq.s32.totalorder %s436_s20, 0  ;;  %p128_p7 = scmp.eq.s32.totalorder %s436_s20, 3 }
   0xf   : > { %s876_s23 = smov (%p33_p4, %s874_s23), 0  ;;  %p134_p10 = scmp.eq.s32.totalorder %s437_s21, 3 }
  0x10   : > { %859 = sst [smem:[#allocation8_spill]] %s876_s23  ;;  %p749_p8 = por %p54_p6, %p53_p5 }
  0x11   : > { %p753_p9 = por %p128_p7, %p47_p1  ;;  %s35_s29 = ssub.s32 %s661_s18, %s876_s23 }
  0x12   : > { %s37_s30 = sor.u32 %s36_s25, %s35_s29  ;;  %p759_p12 = por %p134_p10, %p53_p5 }
  0x13   : > { %p38_p11 = scmp.eq.s32.totalorder %s37_s30, 0  ;;  %p461_p13 = scmp.lt.s32.totalorder %s665_s19, 4 }
  0x14   : > { %s157_s5 = sand.u32 1, %s645_s14   ;;  %s441_s8 = sshll.u32 %s661_s18, 1 }
  0x15   : > { %s766_s6 = scalar_select %p38_p11, %s645_s14, %s40_s24  }
  0x16   : > { %s440_s7 = sshll.u32 %s157_s5, 2  ;;  %s165_s9 = sadd.s32 %s657_s17, %s441_s8 }
  0x17   : > { %s161_s10 = scalar_lea.vmem [#allocation2], %s440_s7  ;;  %s442_s20 = sshll.u32 %s165_s9, 2 }
  0x18   : > { %s171_s11 = sshll.u32 %s161_s10, 4  ;;  %s167_s29 = scalar_lea.hbm %s853_s0, %s442_s20  ;;  %s172_s11 = int_to_ptr.vmem [resolvable:$true] %s171_s11 }
  0x19   : > { %p454_p0 = pnand %p461_p13, %p741_p3  ;;  %s169_s30 = sshll.u32 %s167_s29, 4  ;;  %s170_s30 = int_to_ptr.hbm [resolvable:$true] %s169_s30 }
  0x1a   : > { %p443_p1 = scmp.ge.s32.totalorder %s665_s19, 1  ;;  %s158_s23 = scalar_lea.sflag [#allocation3], %s157_s5 }
  0x1b   : > { %456 = dma.hbm_to_vmem [thread:$0]  (!%p454_p0), %s170_s30, 64, %s172_s11, %s158_s23  }
  0x1c   : > { %p186_p2 = scmp.lt.s32.totalorder %s665_s19, 5 }
  0x1e   : > { %p187_p4 = pnand %p443_p1, %p186_p2 }
  0x1f   : > { %s778_s24 = sand.u32 (!%p187_p4), 1, %s641_s13  }
  0x20   : > { %190 = sbr.rel (%p187_p4) target bundleno = 176 (0xb0), region = 32  ;;  %s444_s7 = sshll.u32 (!%p187_p4), %s778_s24, 2 }
  0x21   : > { %s193_s8 = scalar_lea.sflag (!%p187_p4), [#allocation3], %s778_s24  ;;  %s196_s9 = scalar_lea.vmem (!%p187_p4), [#allocation2], %s444_s7 }
  0x25   : > { %628 = dma.done.wait (%p749_p8), %s193_s8, 64  }
  0x26   : > { %630 = vsyncadd (%p749_p8), %s193_s8, 4294967232  ;;  %v667_v0 = vmov 0   ;;  %v295_v1 = vld [vmem:[%s855_s2] sm:$0xf]  ;;  %vm236_vm0 = vcmask 1043456   ;;  %p226_p3 = scmp.lt.s32.totalorder %s653_s16, 1  ;;  %v254_v17 = vlaneseq }
  0x27   : > { %528 = vset.pattern.permute.xlu0 %v667_v0  ;;  %v233_v2 = vld [vmem:[%s196_s9] sm:$0xf]  ;;  %p228_p5 = scmp.lt.s32.totalorder %s649_s15, 1  ;;  %s446_s29 = sshll.u32 %s653_s16, 1 }
  0x28   : > { %298 = vperm.xlu0 %528, %v295_v1   ;;  %v237_v3 = vsel %vm236_vm0, %v233_v2, -inf  ;;  %s227_s27 = scalar_select %p226_p3, %s653_s16, 1  ;;  %v255_v21 = vshrl.u32 %v254_v17, 7 }
  0x29   : > { %v238_v4 = vrot.slane %v237_v3, 4  ;;  %s229_s5 = scalar_select %p228_p5, %s649_s15, 1 }
  0x2a   : > { %s445_s10 = sshll.u32 %s227_s27, 1  ;;  %s335_s30 = sadd.s32 %s649_s15, %s446_s29 }
  0x2b   : > { %v239_v5 = vmax.f32 %v237_v3, %v238_v4  ;;  %s231_s11 = sadd.s32 %s445_s10, %s229_s5  ;;  %s336_s9 = scalar_lea.hbm %s856_s3, %s335_s30 }
  0x2c   : > { %s232_s25 = scalar_lea.vmem %s854_s1, %s231_s11  ;;  %s225_s16 = scalar_lea.vmem [#allocation5], %s778_s24 }
  0x2d   : > { %v240_v6 = vrot.slane %v239_v5, 2  ;;  %v234_v20 = vld [vmem:[%s232_s25] sm:$0x1]  ;;  %s338_s23 = sshll.u32 %s225_s16, 4  ;;  %s340_s26 = sshll.u32 %s336_s9, 4  ;;  %s339_s23 = int_to_ptr.vmem [resolvable:$true] %s338_s23  ;;  %s341_s26 = int_to_ptr.hbm [resolvable:$true] %s340_s26 }
  0x2e   : > { %v235_v22 = vunpack.c.0.s8 %v234_v20  ;;  %s326_s15 = scalar_lea.sflag [#allocation4], %s778_s24  ;;  %s581_s27 = sshra.s32 %s341_s26, 4  ;;  %s582_s27 = int_to_ptr.hbm [resolvable:$true] %s581_s27 }
  0x2f   : > { %v241_v7 = vmax.f32 %v239_v5, %v240_v6  ;;  %s583_s5 = scalar_lea.hbm %s582_s27, 1  ;;  %s587_s20 = scalar_lea.hbm %s856_s3, 4 }
  0x30   : > { %v256_v24 = vperm.slane %v235_v22, 0  ;;  %p584_p6 = scmp.ne.s32.totalorder %s582_s27, %s583_s5  ;;  %p588_p10 = scmp.lt.s32.totalorder %s582_s27, %s856_s3 }
  0x31   : > { %v242_v8 = vrot.slane %v241_v7, 1  ;;  %p589_p11 = scmp.lt.s32.totalorder %s587_s20, %s583_s5 }
  0x32   : > { %vm257_vm1 = vcmp.eq.s32.totalorder %v255_v21, %v256_v24  ;;  %p585_p7 = pnand %p584_p6, %p753_p9 }
  0x33   : > { %v790_v9 = vmax.f32 %v241_v7, %v242_v8  ;;  %v258_v46 = vsel %vm257_vm1, %v233_v2, 0.0  ;;  %p590_p13 = por %p589_p11, %p588_p10 }
  0x34   : > { %v259_v48 = vsel %vm236_vm0, %v258_v46, 0.0  ;;  %p586_p8 = pneg %p585_p7 }
  0x35   : > { %v244_v10 = vsub.f32 %v233_v2, %v790_v9  ;;  %v260_v49 = vrot.slane %v259_v48, 4 }
  0x36   : > { %p591_p0 = pnand %p590_p13, %p586_p8 }
  0x37   : > { %v245_v11 = vmul.f32 1.442695, %v244_v10  ;;  %v261_v51 = vadd.f32 %v260_v49, %v259_v48 }
  0x39   : > { %529 = vpow2.f32 %v245_v11  ;;  %v262_v53 = vrot.slane %v261_v51, 2 }
  0x3b   : > { %v263_v55 = vadd.f32 %v262_v53, %v261_v51 }
  0x3d   : > { %v264_v57 = vrot.slane %v263_v55, 1 }
  0x3f   : > { %v530_v12 = vpop.eup %529  ;;  %v265_v63 = vadd.f32 %v264_v57, %v263_v55 }
  0x40   : > { %v247_v13 = vsel %vm236_vm0, %v530_v12, 0.0  ;;  %v266_v25 = vsel %vm257_vm1, %v530_v12, 0.0 }
  0x41   : > { %v248_v14 = vrot.slane %v247_v13, 4  ;;  %v267_v26 = vsel %vm236_vm0, %v266_v25, 0.0  ;;  %v274_v5 = vsub.f32 %v265_v63, %v790_v9 }
  0x42   : > { %v268_v27 = vrot.slane %v267_v26, 4 }
  0x43   : > { %v249_v15 = vadd.f32 %v248_v14, %v247_v13 }
  0x44   : > { %v269_v29 = vadd.f32 %v268_v27, %v267_v26 }
  0x45   : > { %v250_v16 = vrot.slane %v249_v15, 2 }
  0x46   : > { %v270_v31 = vrot.slane %v269_v29, 2 }
  0x47   : > { %v251_v18 = vadd.f32 %v250_v16, %v249_v15 }
  0x48   : > { %v271_v33 = vadd.f32 %v270_v31, %v269_v29 }
  0x49   : > { %v252_v19 = vrot.slane %v251_v18, 1 }
  0x4a   : > { %v272_v38 = vrot.slane %v271_v33, 1 }
  0x4b   : > { %v253_v23 = vadd.f32 %v252_v19, %v251_v18 }
  0x4c   : > { %v273_v41 = vadd.f32 %v272_v38, %v271_v33 }
  0x4d   : > { %531 = vrcp.f32 %v253_v23  ;;  %v289_v35 = vand.u32 2147483648, %v253_v23  ;;  %vm283_vm2 = vweird.f32 %v253_v23  ;;  %v287_v37 = vand.u32 2147483647, %v253_v23 }
  0x4f   : > { %v290_v39 = vor.u32 1.1754944e-38, %v289_v35  ;;  %vm288_vm5 = vcmp.eq.f32.partialorder %v287_v37, 8.507059e+37 }
  0x53   : > { %v532_v28 = vpop.eup %531 }
  0x54   : > { %v279_v30 = vmul.f32 %v532_v28, %v253_v23  ;;  %vm284_vm3 = vweird.f32 %v532_v28 }
  0x55   : > { %vm285_vm4 = vmor %vm283_vm2, %vm284_vm3 }
  0x56   : > { %v280_v32 = vsub.f32 1.0, %v279_v30 }
  0x58   : > { %v281_v34 = vmul.f32 %v532_v28, %v280_v32 }
  0x5a   : > { %v282_v36 = vadd.f32 %v532_v28, %v281_v34 }
  0x5c   : > { %v286_v40 = vsel %vm285_vm4, %v532_v28, %v282_v36 }
  0x5d   : > { %v291_v42 = vsel %vm288_vm5, %v290_v39, %v286_v40 }
  0x5e   : > { %v292_v43 = vmul.f32 %v291_v42, %v273_v41 }
  0x60   : > { %v293_v44 = vsub.f32 1.0, %v292_v43 }
  0x62   : > { %v294_v45 = vmax.f32 %v293_v44, 0.0 }
  0x64   : > { %533 = vrsqrt.f32 %v294_v45  ;;  %vm317_vm6 = vcmp.eq.f32.partialorder %v294_v45, inf  ;;  %v320_v4 = vand.u32 2147483648, %v294_v45  ;;  %vm319_vm7 = vcmp.eq.f32.partialorder %v294_v45, 0.0 }
  0x65   : > { %535 = vlog2.f32 %v253_v23 }
  0x6a   : > { %v534_v47 = vpop.eup %533 }
  0x6b   : > { %v311_v50 = vmul.f32 %v534_v47, %v294_v45  ;;  %v536_v62 = vpop.eup %535 }
  0x6c   : > { %v276_v3 = vmul.f32 0.6931472, %v536_v62 }
  0x6d   : > { %v312_v52 = vmul.f32 %v534_v47, %v311_v50 }
  0x6e   : > { %v277_v11 = vsub.f32 %v274_v5, %v276_v3 }
  0x6f   : > { %v313_v54 = vmul.f32 0.5, %v312_v52 }
  0x71   : > { %v314_v56 = vsub.f32 1.5, %v313_v54 }
  0x73   : > { %v315_v58 = vmul.f32 %v534_v47, %v314_v56 }
  0x75   : > { %v316_v1 = vmul.f32 %v315_v58, %v294_v45 }
  0x77   : > { %v318_v7 = vsel %vm317_vm6, %v294_v45, %v316_v1 }
  0x78   : > { %v321_v10 = vsel %vm319_vm7, %v320_v4, %v318_v7 }
  0x79   : > { %v322_v14 = vmul.f32 -1.0, %v321_v10 }
  0x9a   : > { %v299_v59 = vpop.permute.xlu0 %298 }
  0x9b   : > { %v301_v60 = vsel %vm257_vm1, %v299_v59, 0.0 }
  0x9c   : > { %v302_v61 = vsel %vm236_vm0, %v301_v60, 0.0 }
  0x9d   : > { %v303_v0 = vrot.slane %v302_v61, 4 }
  0x9f   : > { %v304_v2 = vadd.f32 %v303_v0, %v302_v61 }
  0xa1   : > { %v305_v6 = vrot.slane %v304_v2, 2 }
  0xa3   : > { %v306_v8 = vadd.f32 %v305_v6, %v304_v2 }
  0xa5   : > { %v307_v12 = vrot.slane %v306_v8, 1 }
  0xa7   : > { %v308_v13 = vadd.f32 %v307_v12, %v306_v8 }
  0xa9   : > { %v309_v9 = vmul.f32 %v308_v13, %v277_v11 }
  0xab   : > { %v323_v15 = vmul.f32 %v322_v14, %v309_v9 }
  0xad   : > { %324 = vst [vmem:[%s225_s16] sm:$0x1] %v323_v15 }
  0xae   : > { %594 = shalt.err (!%p591_p0)
}
  0xaf   : > { %451 = dma.vmem_to_hbm [thread:$0]  (%p753_p9), %s339_s23, 16, %s341_s26, %s326_s15  }
  0xb0 PF: > { %p462_p1 = scmp.ge.s32.totalorder %s665_s19, 2  ;;  %s352_s24 = sand.u32 1, %s637_s12  }
  0xb1   : > { %s353_s29 = scalar_lea.sflag [#allocation4], %s352_s24 }
  0xb2   : > { %p458_p2 = pnand %p462_p1, %p759_p12 }
  0xb4   : > { %p459_p4 = pneg %p458_p2 }
  0xb6   : > { %632 = dma.done.wait (%p459_p4), %s353_s29, 16  }
  0xb7   : > { %634 = vsyncadd (%p459_p4), %s353_s29, 4294967280  ;;  %s19_s19 = sadd.s32 1, %s665_s19   ;;  %s863_s28 = sld [smem:[#allocation8_spill]] }
  0xb8   : > { %p16_p3 = scmp.ge.s32.totalorder %s19_s19, 6   ;;  %s864_s12 = smov %s641_s13 }
  0xb9   : > { %s865_s13 = smov %s645_s14  ;;  %s866_s14 = smov %s766_s6 }
  0xba   : > { %s867_s15 = smov %s657_s17  ;;  %s868_s16 = smov %s661_s18 }
  0xbb   : > { %s869_s17 = smov %s872_s22  ;;  %18 = sbr.rel (!%p16_p3) target bundleno = 7 (0x7), region = 80 }
  0xbd   : > { %s870_s18 = smov %s863_s28 }
  0xc0   :  { %358 = vsyncpa [#allocation3], 1 }
  0xc1   :  { %360 = vsyncpa [#allocation3 + $0x1], 1 }
  0xc2   :  { %361 = vsyncpa [#allocation4], 1 }
  0xc3   :  { %363 = vsyncpa [#allocation4 + $0x1], 1 }

</bundles_post_ra>
